<compile_context>
chip_gen: v7x
topology: tpu7x:2x2x1
jax: 0.10.0
libtpu: 0.0.40
codegen_flags: <defaults>
</compile_context>

<pallas_src>
import jax
import jax.numpy as jnp
from jax.experimental import pallas as pl
from jax.experimental.pallas import tpu as pltpu

_LANE = 128   # lane width: hidden dim padded to this (weights prepared offline)
_SUB = 8      # sublane width: batch padded to a multiple of this


def _round_up(x, m):
    return (x + m - 1) // m * m


def _pad_to(x, shape):
    pads = [(0, t - s) for s, t in zip(x.shape, shape)]
    if all(p == (0, 0) for p in pads):
        return x
    return jnp.pad(x, pads)


def _dual_tensorcore():
    """True on dual-TensorCore chips (v7x); conservative False otherwise."""
    try:
        return "v7" in jax.devices()[0].device_kind.lower()
    except Exception:
        return False


def _vmem_limit_bytes(footprint):
    """Only raise the scoped-VMEM limit when the working set needs it."""
    default_scoped = 16 << 20          # smallest default (v5e); v6e/v7x default 32 MiB
    if 2 * footprint <= default_scoped:
        return None                    # defaults are plenty — don't touch the limit
    try:
        cap = int(pltpu.get_tpu_info().vmem_capacity_bytes)
    except Exception:
        cap = 64 << 20                 # conservative: v7x per-core VMEM
    return int(min(max(2 * footprint, default_scoped), 0.6 * cap))


def actor_sac_fwd_kernel(s_ref, w1_ref, b1_ref, w23_ref, b23_ref, o_ref):
    # Cast the raw f32 state tile to the weights' compute dtype inside the kernel.
    x = s_ref[...].astype(w1_ref.dtype)
    # Layer 1: Linear + ReLU (f32 accumulation, f32 elementwise — v5e-safe).
    h1 = jnp.dot(x, w1_ref[...], preferred_element_type=jnp.float32) + b1_ref[...]
    h1 = jnp.maximum(h1, 0.0)
    # Folded (encoder layer 2) @ (decoder_a_avg): single matmul, then tanh.
    a = jnp.dot(h1.astype(w23_ref.dtype), w23_ref[...],
                preferred_element_type=jnp.float32) + b23_ref[...]
    o_ref[...] = jnp.tanh(a).astype(o_ref.dtype)


def prepare_actor_params(params, compute_dtype=jnp.bfloat16):
    """One-time fold + pad of ActorSAC weights (hoisted out of the per-call path).

    params: (w1, b1, w2, b2, w3, b3) with w stored as (in, out), b as (1, out).
    Returns (w1p, b1p, w23p, b23p) ready for actor_sac_forward.
    """
    w1, b1, w2, b2, w3, b3 = params
    state_dim, h1_dim = w1.shape
    action_dim = w3.shape[1]

    # Fold encoder layer 2 with decoder_a_avg (no activation between them), in f32.
    w23 = w2.astype(jnp.float32) @ w3.astype(jnp.float32)
    b23 = b2.astype(jnp.float32) @ w3.astype(jnp.float32) + b3.astype(jnp.float32)

    # Only the hidden dim is padded to lane width (zeros keep the math exact);
    # the state K-dim and action N-dim keep their true widths.
    hp = _round_up(h1_dim, _LANE)
    w1p = _pad_to(w1.astype(jnp.float32), (state_dim, hp)).astype(compute_dtype)
    b1p = _pad_to(b1.astype(jnp.float32), (1, hp))
    w23p = _pad_to(w23, (hp, action_dim)).astype(compute_dtype)
    b23p = b23                                            # (1, action_dim), f32
    return (w1p, b1p, w23p, b23p)


def actor_sac_forward(state, prepared_params, *, batch_tile=None):
    """Fused ActorSAC forward: tanh(relu(state @ W1 + b1) @ W23 + b23).

    state           : (B, state_dim) f32
    prepared_params : output of prepare_actor_params (computed once, reused)
    Returns (B, action_dim) f32.
    """
    w1p, b1p, w23p, b23p = prepared_params
    B, state_dim = state.shape
    assert w1p.shape[0] == state_dim
    hp = w1p.shape[1]
    action_dim = w23p.shape[1]

    # Pad batch only to a sublane multiple (cheap, tiny); no feature padding.
    state = state.astype(jnp.float32)
    Bp = _round_up(B, _SUB)
    if Bp != B:
        state = _pad_to(state, (Bp, state_dim))

    # Generation-aware batch tile.
    if batch_tile is None:
        if _dual_tensorcore():
            # v7x: split across the 2 TensorCores only when each core gets
            # >=2 pipelined grid steps.
            if Bp >= 4 * 512:
                batch_tile = 512
            elif Bp >= 4 * _SUB:
                batch_tile = _round_up(pl.cdiv(Bp, 4), _SUB)
            else:
                batch_tile = Bp
        else:
            # v5e/v6e: grid is a serial loop on one TC — single step for small
            # batches; 512-row tiles (~85% of HBM roofline) for big ones.
            batch_tile = Bp if Bp <= 1024 else 512
    batch_tile = min(_round_up(batch_tile, _SUB), Bp)
    grid = (pl.cdiv(Bp, batch_tile),)   # cdiv: never inflate the batch to a tile multiple

    it = jnp.dtype(w1p.dtype).itemsize
    footprint = (2 * batch_tile * state_dim * 4          # state tile (double-buffered, f32)
                 + 2 * batch_tile * action_dim * 4       # output tile (double-buffered, f32)
                 + 2 * (state_dim * hp + hp * action_dim) * it   # weights (default 2 buffers)
                 + 2 * (hp + action_dim) * 4)                    # biases
    vmem_limit = _vmem_limit_bytes(footprint)

    cost = pl.CostEstimate(
        flops=2 * Bp * (state_dim * hp + hp * action_dim),
        transcendentals=Bp * action_dim,
        bytes_accessed=(Bp * state_dim * 4 + w1p.size * it + w23p.size * it
                        + b1p.size * 4 + b23p.size * 4 + Bp * action_dim * 4),
    )

    out = pl.pallas_call(
        actor_sac_fwd_kernel,
        out_shape=jax.ShapeDtypeStruct((Bp, action_dim), jnp.float32),
        grid_spec=pl.GridSpec(
            grid=grid,
            in_specs=[
                # last block dim == full array dim, so widths < 128 are legal
                pl.BlockSpec((batch_tile, state_dim), lambda i: (i, 0)),
                pl.BlockSpec((state_dim, hp), lambda i: (0, 0)),
                pl.BlockSpec((1, hp), lambda i: (0, 0)),
                pl.BlockSpec((hp, action_dim), lambda i: (0, 0)),
                pl.BlockSpec((1, action_dim), lambda i: (0, 0)),
            ],
            out_specs=pl.BlockSpec((batch_tile, action_dim), lambda i: (i, 0)),
        ),
        compiler_params=pltpu.CompilerParams(
            dimension_semantics=("parallel",),
            vmem_limit_bytes=vmem_limit,
        ),
        cost_estimate=cost,
    )(state, w1p, b1p, w23p, b23p)

    return out if Bp == B else out[:B]


# ---------------------------------------------------------------------------
# Reference / test harness
# ---------------------------------------------------------------------------
def init_linear(key, fan_in, fan_out):
    """PyTorch nn.Linear default init: U(-1/sqrt(fan_in), 1/sqrt(fan_in))."""
    kw, kb = jax.random.split(key)
    bound = 1.0 / jnp.sqrt(fan_in)
    # stored as (in, out) so the kernel computes x @ W
    w = jax.random.uniform(kw, (fan_in, fan_out), jnp.float32, -bound, bound)
    b = jax.random.uniform(kb, (1, fan_out), jnp.float32, -bound, bound)
    return w, b


def make_actor_params(key, state_dim, net_dims, action_dim):
    assert len(net_dims) == 2, "this script builds the 2-hidden-layer variant"
    k1, k2, k3 = jax.random.split(key, 3)
    w1, b1 = init_linear(k1, state_dim, net_dims[0])
    w2, b2 = init_linear(k2, net_dims[0], net_dims[1])
    w3, b3 = init_linear(k3, net_dims[1], action_dim)
    return (w1, b1, w2, b2, w3, b3)


def reference_forward(state, params):
    w1, b1, w2, b2, w3, b3 = params
    h1 = jnp.maximum(state @ w1 + b1, 0.0)
    h2 = h1 @ w2 + b2
    return jnp.tanh(h2 @ w3 + b3)


if __name__ == "__main__":
    key = jax.random.PRNGKey(0)
    k_param, k_state = jax.random.split(key)

    batch, state_dim, action_dim = 8, 16, 8
    net_dims = [32, 32]

    params = make_actor_params(k_param, state_dim, net_dims, action_dim)
    state = jax.random.normal(k_state, (batch, state_dim), jnp.float32)

    ref = reference_forward(state, params)

    # f32 compute path: tight check (only difference vs reference is the W2@W3 fold).
    prepared_f32 = prepare_actor_params(params, compute_dtype=jnp.float32)
    out_f32 = jax.block_until_ready(actor_sac_forward(state, prepared_f32))
    assert out_f32.shape == (batch, action_dim)
    assert jnp.allclose(out_f32, ref, atol=1e-4, rtol=1e-4)

    # default bf16 operand path (v6e/v7x recommendation): loose check.
    prepared_bf16 = prepare_actor_params(params, compute_dtype=jnp.bfloat16)
    out_bf16 = jax.block_until_ready(actor_sac_forward(state, prepared_bf16))
    assert out_bf16.shape == (batch, action_dim)
    assert jnp.allclose(out_bf16, ref, atol=3e-2, rtol=3e-2)

    print("KERNEL_OK")
</pallas_src>

<mosaic_0001>
module attributes {stable_mosaic.version = 11 : i64} {
  func.func @actor_sac_fwd_kernel(%arg0: i32, %arg1: memref<8x16xf32, #tpu.memory_space<vmem>>, %arg2: memref<16x128xf32, #tpu.memory_space<vmem>>, %arg3: memref<1x128xf32, #tpu.memory_space<vmem>>, %arg4: memref<128x8xf32, #tpu.memory_space<vmem>>, %arg5: memref<1x8xf32, #tpu.memory_space<vmem>>, %arg6: memref<8x8xf32, #tpu.memory_space<vmem>>) attributes {dimension_semantics = [#tpu.dimension_semantics<parallel>], iteration_bounds = array<i64: 1>, scalar_prefetch = 0 : i64, scratch_operands = 0 : i64, tpu.core_type = #tpu.core_type<tc>, window_params = [{transform_indices = @transform_0, window_bounds = array<i64: 8, 16>}, {pipeline_mode = #tpu.pipeline_mode<synchronous>, transform_indices = @transform_1, window_bounds = array<i64: 16, 128>}, {pipeline_mode = #tpu.pipeline_mode<synchronous>, transform_indices = @transform_2, window_bounds = array<i64: 1, 128>}, {pipeline_mode = #tpu.pipeline_mode<synchronous>, transform_indices = @transform_3, window_bounds = array<i64: 128, 8>}, {pipeline_mode = #tpu.pipeline_mode<synchronous>, transform_indices = @transform_4, window_bounds = array<i64: 1, 8>}, {transform_indices = @transform_5, window_bounds = array<i64: 8, 8>}]} {
    %c0 = arith.constant 0 : index
    %c0_0 = arith.constant 0 : index
    %0 = vector.load %arg1[%c0, %c0_0] : memref<8x16xf32, #tpu.memory_space<vmem>>, vector<8x16xf32>
    %c0_1 = arith.constant 0 : index
    %c0_2 = arith.constant 0 : index
    %1 = vector.load %arg2[%c0_1, %c0_2] : memref<16x128xf32, #tpu.memory_space<vmem>>, vector<16x128xf32>
    %cst = arith.constant dense<0.000000e+00> : vector<8x128xf32>
    %2 = tpu.matmul %0, %1, %cst {dimension_numbers = #tpu.dot_dimension_numbers<[1], [0], [0], [1], [0, 0, 1, 1], [], []>} : vector<8x16xf32>, vector<16x128xf32>, vector<8x128xf32> -> vector<8x128xf32>
    %c0_3 = arith.constant 0 : index
    %c0_4 = arith.constant 0 : index
    %3 = vector.load %arg3[%c0_3, %c0_4] : memref<1x128xf32, #tpu.memory_space<vmem>>, vector<1x128xf32>
    %4 = vector.broadcast %3 : vector<1x128xf32> to vector<8x128xf32>
    %5 = arith.addf %2, %4 : vector<8x128xf32>
    %cst_5 = arith.constant 0.000000e+00 : f32
    %6 = vector.broadcast %cst_5 : f32 to vector<8x128xf32>
    %7 = arith.maximumf %5, %6 : vector<8x128xf32>
    %c0_6 = arith.constant 0 : index
    %c0_7 = arith.constant 0 : index
    %8 = vector.load %arg4[%c0_6, %c0_7] : memref<128x8xf32, #tpu.memory_space<vmem>>, vector<128x8xf32>
    %cst_8 = arith.constant dense<0.000000e+00> : vector<8x8xf32>
    %9 = tpu.matmul %7, %8, %cst_8 {dimension_numbers = #tpu.dot_dimension_numbers<[1], [0], [0], [1], [0, 0, 1, 1], [], []>} : vector<8x128xf32>, vector<128x8xf32>, vector<8x8xf32> -> vector<8x8xf32>
    %c0_9 = arith.constant 0 : index
    %c0_10 = arith.constant 0 : index
    %10 = vector.load %arg5[%c0_9, %c0_10] : memref<1x8xf32, #tpu.memory_space<vmem>>, vector<1x8xf32>
    %11 = vector.broadcast %10 : vector<1x8xf32> to vector<8x8xf32>
    %12 = arith.addf %9, %11 : vector<8x8xf32>
    %13 = math.tanh %12 : vector<8x8xf32>
    %c0_11 = arith.constant 0 : index
    %c0_12 = arith.constant 0 : index
    %14 = vector.load %arg6[%c0_11, %c0_12] : memref<8x8xf32, #tpu.memory_space<vmem>>, vector<8x8xf32>
    tpu.vector_store %arg6[%c0_11, %c0_12], %13 {strides = array<i32>} : memref<8x8xf32, #tpu.memory_space<vmem>>, vector<8x8xf32>,
    return
  }
  func.func @transform_0(%arg0: i32) -> (i32, i32) {
    %c0_i32 = arith.constant 0 : i32
    %c0_i32_0 = arith.constant 0 : i32
    return %arg0, %c0_i32 : i32, i32
  }
  func.func @transform_1(%arg0: i32) -> (i32, i32) {
    %c0_i32 = arith.constant 0 : i32
    %c0_i32_0 = arith.constant 0 : i32
    %c0_i32_1 = arith.constant 0 : i32
    return %c0_i32, %c0_i32_0 : i32, i32
  }
  func.func @transform_2(%arg0: i32) -> (i32, i32) {
    %c0_i32 = arith.constant 0 : i32
    %c0_i32_0 = arith.constant 0 : i32
    %c0_i32_1 = arith.constant 0 : i32
    return %c0_i32, %c0_i32_0 : i32, i32
  }
  func.func @transform_3(%arg0: i32) -> (i32, i32) {
    %c0_i32 = arith.constant 0 : i32
    %c0_i32_0 = arith.constant 0 : i32
    %c0_i32_1 = arith.constant 0 : i32
    return %c0_i32, %c0_i32_0 : i32, i32
  }
  func.func @transform_4(%arg0: i32) -> (i32, i32) {
    %c0_i32 = arith.constant 0 : i32
    %c0_i32_0 = arith.constant 0 : i32
    %c0_i32_1 = arith.constant 0 : i32
    return %c0_i32, %c0_i32_0 : i32, i32
  }
  func.func @transform_5(%arg0: i32) -> (i32, i32) {
    %c0_i32 = arith.constant 0 : i32
    %c0_i32_0 = arith.constant 0 : i32
    return %arg0, %c0_i32 : i32, i32
  }
}

</mosaic_0001>

<bundles_post_ra>
// kernel: tpu_custom_call.1
= control target key start
LH: loop header
LB: loop body
LE: loop exit
PB: predicated region body
PF: predicated region fallthrough
CT: control target
= control target key end

     0   :  { %v338_v2 = vmov 0.0|0.0   ;;  %vm339_vm0 = vmmov 0   ;;  %v340_v4 = vmov 0.0   ;;  %vm31_vm1 = vcmask 130048   ;;  %s447_s0 = inlined_call_operand.vmem [shape: f32[8,16], index: 0, kind: input, shape index: {}]   ;;  %s448_s1 = inlined_call_operand.vmem [shape: f32[16,128], index: 1, kind: input, shape index: {}]   ;;  %s449_s2 = inlined_call_operand.vmem [shape: f32[1,128], index: 2, kind: input, shape index: {}]   ;;  %s450_s3 = inlined_call_operand.vmem [shape: f32[128,8], index: 3, kind: input, shape index: {}]   ;;  %s451_s4 = inlined_call_operand.vmem [shape: f32[1,8], index: 4, kind: input, shape index: {}]   ;;  %s452_s5 = inlined_call_operand.hbm [shape: f32[8,8], index: 5, kind: output, shape index: {}]  }
   0x1   :  { %v22_v0 = vld [vmem:[%s448_s1] sm:$0xff]  ;;  %v23_v1 = vld [vmem:[%s448_s1 + $0x8] sm:$0xff]  ;;  %281 = vmatprep.subr.bf16.mxu0 %v338_v2  ;;  %243 = vmatprep.mubr.msk.f32.mxu0 %vm339_vm0, %v340_v4  ;;  %v108_v7 = vld [vmem:[%s450_s3 + $0x10] sm:$0xff] }
   0x2   :  { %v282_v3 = vpack.c.bf16 %v23_v1, %v22_v0  ;;  %v106_v5 = vld [vmem:[%s450_s3] sm:$0xff]  ;;  %v107_v6 = vld [vmem:[%s450_s3 + $0x8] sm:$0xff]  ;;  %284 = vmatprep.subr.bf16.mxu1 %v338_v2  ;;  %v109_v9 = vld [vmem:[%s450_s3 + $0x18] sm:$0xff]  ;;  %278 = vmatprep.mubr.msk.f32.mxu1 %vm339_vm0, %v340_v4 }
   0x3   :  { %v285_v8 = vpack.c.bf16 %v107_v6, %v106_v5  ;;  %v21_v10 = vld [vmem:[%s447_s0] sm:$0xff]  ;;  %v288_v11 = vpack.c.bf16 %v109_v9, %v108_v7  ;;  %v111_v13 = vld [vmem:[%s450_s3 + $0x28] sm:$0xff] }
   0x4   :  { %283 = vmatpush3.bf16.msra.mxu0 %v282_v3  ;;  %v110_v12 = vld [vmem:[%s450_s3 + $0x20] sm:$0xff] }
   0x5   :  { %286 = vmatpush3.bf16.msra.mxu1 %v285_v8 }
   0x6   :  { %287 = vmatprep.subr.bf16.mxu1 %v338_v2 }
   0x7   :  { %244 = vmatmul.mubr.msk.f32.vlgmr.msra.gmra.mrb[0].mxu0 %vm31_vm1, %v21_v10 }
   0x8   :  { %10 = vsyncpa [#allocation3], 0  ;;  %v291_v14 = vpack.c.bf16 %v111_v13, %v110_v12  ;;  %v112_v15 = vld [vmem:[%s450_s3 + $0x30] sm:$0xff]  ;;  %v113_v16 = vld [vmem:[%s450_s3 + $0x38] sm:$0xff]  ;;  %vm200_vm2 = vcmask 64512  }
   0x9   :  { %289 = vmatpush3.bf16.msra.mxu1 %v288_v11  ;;  %v294_v17 = vpack.c.bf16 %v113_v16, %v112_v15  ;;  %v114_v18 = vld [vmem:[%s450_s3 + $0x40] sm:$0xff]  ;;  %v115_v19 = vld [vmem:[%s450_s3 + $0x48] sm:$0xff]  ;;  %v116_v21 = vld [vmem:[%s450_s3 + $0x50] sm:$0xff] }
   0xa   :  { %290 = vmatprep.subr.bf16.mxu1 %v338_v2  ;;  %v297_v20 = vpack.c.bf16 %v115_v19, %v114_v18  ;;  %v117_v22 = vld [vmem:[%s450_s3 + $0x58] sm:$0xff]  ;;  %v118_v24 = vld [vmem:[%s450_s3 + $0x60] sm:$0xff]  ;;  %v119_v25 = vld [vmem:[%s450_s3 + $0x68] sm:$0xff] }
   0xb   :  { %v300_v23 = vpack.c.bf16 %v117_v22, %v116_v21  ;;  %v303_v26 = vpack.c.bf16 %v119_v25, %v118_v24  ;;  %v120_v27 = vld [vmem:[%s450_s3 + $0x70] sm:$0xff]  ;;  %v121_v28 = vld [vmem:[%s450_s3 + $0x78] sm:$0xff]  ;;  %v216_v30 = vld [vmem:[%s449_s2] ss:$0 sm:$0xff]  ;;  %s341_s3 = smov [#allocation2]  }
   0xc   :  { %v306_v29 = vpack.c.bf16 %v121_v28, %v120_v27  ;;  %v218_v35 = vld [vmem:[%s451_s4] ss:$0 sm:$0xff]  ;;  %s208_s7 = sshll.u32 %s341_s3, 4  ;;  %s209_s7 = int_to_ptr.vmem [resolvable:$true] %s208_s7 }
   0xd   :  { %292 = vmatpush3.bf16.msra.mxu1 %v291_v14  ;;  %s314_s2 = scalar_lea.vmem %s209_s7, 128  ;;  %p319_p1 = scmp.lt.s32.totalorder %s209_s7, %s209_s7 }
   0xe   :  { %293 = vmatprep.subr.bf16.mxu1 %v338_v2  ;;  %p315_p0 = scmp.ne.s32.totalorder %s209_s7, %s314_s2  ;;  %p320_p2 = scmp.lt.s32.totalorder %s314_s2, %s314_s2 }
  0x10   :  { %p321_p3 = por %p320_p2, %p319_p1 }
  0x11   :  { %295 = vmatpush3.bf16.msra.mxu1 %v294_v17 }
  0x12   :  { %296 = vmatprep.subr.bf16.mxu1 %v338_v2  ;;  %p322_p4 = pnand %p321_p3, %p315_p0 }
  0x15   :  { %298 = vmatpush3.bf16.msra.mxu1 %v297_v20 }
  0x16   :  { %299 = vmatprep.subr.bf16.mxu1 %v338_v2 }
  0x19   :  { %301 = vmatpush3.bf16.msra.mxu1 %v300_v23 }
  0x1a   :  { %302 = vmatprep.subr.bf16.mxu1 %v338_v2 }
  0x1d   :  { %304 = vmatpush3.bf16.msra.mxu1 %v303_v26 }
  0x1e   :  { %305 = vmatprep.subr.bf16.mxu1 %v338_v2 }
  0x21   :  { %307 = vmatpush3.bf16.msra.mxu1 %v306_v29 }
  0xda   :  { %v101_v31 = vpop.f32.mrb[0].mxu0 }
  0xdb   :  { %v102_v32 = vadd.f32 %v216_v30, %v101_v31  ;;  %v245_v33 = vpop.f32.mrb[1].mxu0 }
  0xdd   :  { %v105_v34 = vmax.f32 %v102_v32, 0.0 }
  0xdf   :  { %279 = vmatmul.mubr.f32.vlgmr.msra.gmra.mrb[0].mxu1 %v105_v34 }
 0x1b2   :  { %v195_v36 = vpop.f32.mrb[0].mxu1 }
 0x1b3   :  { %v196_v37 = vadd.f32 %v218_v35, %v195_v36  ;;  %v280_v38 = vpop.f32.mrb[1].mxu1 }
 0x1b5   :  { %312 = vtanh.f32 %v196_v37 }
 0x1bf   :  { %v313_v39 = vpop.eup %312 }
 0x1c0   :  { %201 = vst.msk [vmem:[#allocation2] sm:$0xff] %vm200_vm2, %v313_v39 }
 0x1c1   :  { %325 = shalt.err (!%p322_p4)
}
 0x1c2   :  { %s326_s4 = scalar_lea.hbm %s452_s5, 128 }
 0x1c3   :  { %p327_p5 = scmp.ne.s32.totalorder %s452_s5, %s326_s4  ;;  %p330_p6 = scmp.lt.u32.totalorder %s326_s4, %s452_s5 }
 0x1c5   :  { %p332_p7 = pnand %p330_p6, %p327_p5 }
 0x1c7   :  { %335 = shalt.err (!%p332_p7)
}
 0x1c8   :  { %211 = dma.vmem_to_hbm [thread:$0]  %s209_s7, 128, %s452_s5, [#allocation3]  }
 0x1c9   :  { %336 = dma.done.wait [#allocation3], 128  }
 0x1ca   :  { %337 = vsyncadd [#allocation3], 4294967168 }
 0x1cb   :  { %215 = vsyncpa [#allocation3], 1 }

</bundles_post_ra>
